<compile_context>
chip_gen: v7x
topology: tpu7x:2x2x1
jax: 0.10.0
libtpu: 0.0.40
codegen_flags: <defaults>
</compile_context>

<pallas_src>
import functools

import jax
import jax.numpy as jnp
from jax.experimental import pallas as pl
from jax.experimental.pallas import tpu as pltpu

LANE = 128  # TPU lane width


def _round_up(n: int, m: int) -> int:
    return ((n + m - 1) // m) * m


# ----------------------------- Pallas kernel --------------------------------
def classifier_kernel(x_ref, w1_ref, b1_ref, w2_ref, b2_ref, w3_ref, b3_ref, o_ref):
    # encoder layer 1: Linear + ReLU   (bf16 matmul inputs, f32 accumulation)
    x = x_ref[...].astype(jnp.bfloat16)
    h = jnp.dot(x, w1_ref[...], preferred_element_type=jnp.float32)
    h = jnp.maximum(h + b1_ref[...], 0.0)            # f32 epilogue
    # encoder layer 2: Linear + ReLU
    h = jnp.dot(h.astype(jnp.bfloat16), w2_ref[...],
                preferred_element_type=jnp.float32)
    h = jnp.maximum(h + b2_ref[...], 0.0)
    # pred head: Linear (logits, no activation)
    logits = jnp.dot(h.astype(jnp.bfloat16), w3_ref[...],
                     preferred_element_type=jnp.float32) + b3_ref[...]
    o_ref[...] = logits.astype(o_ref.dtype)


# -------------------------- one-time param prep ------------------------------
def prepare_params(params):
    """Pad feature dims to multiples of 128 and cast weights to bf16 (done once)."""
    w1, b1, w2, b2, w3, b3 = params
    d_in, hid = w1.shape
    n_cls = w3.shape[1]
    d_in_p = _round_up(d_in, LANE)
    hid_p = _round_up(hid, LANE)
    c_p = _round_up(n_cls, LANE)

    def pad2(a, rows, cols):
        return jnp.pad(a, ((0, rows - a.shape[0]), (0, cols - a.shape[1])))

    w1p = pad2(w1, d_in_p, hid_p).astype(jnp.bfloat16)
    w2p = pad2(w2, hid_p, hid_p).astype(jnp.bfloat16)
    w3p = pad2(w3, hid_p, c_p).astype(jnp.bfloat16)
    b1p = pad2(b1, 1, hid_p)   # biases stay f32 (added to f32 accumulators)
    b2p = pad2(b2, 1, hid_p)
    b3p = pad2(b3, 1, c_p)
    return (w1p, b1p, w2p, b2p, w3p, b3p)


# ------------------------------- forward -------------------------------------
@functools.partial(jax.jit, static_argnames=("n_classes", "tb"))
def classifier_forward(x, padded_params, *, n_classes, tb=128):
    """x: [B, D_in] f32 -> logits [B, n_classes] f32 (single fused Pallas kernel)."""
    w1, b1, w2, b2, w3, b3 = padded_params
    B, d_in = x.shape
    d_in_p, hid_p = w1.shape
    c_p = w3.shape[1]

    # Pad batch to a multiple of the batch tile and features to the padded lane dim.
    b_pad = _round_up(max(B, tb), tb)
    x_p = jnp.pad(x, ((0, b_pad - B), (0, d_in_p - d_in)))
    grid = (b_pad // tb,)

    flops = 2 * b_pad * (d_in_p * hid_p + hid_p * hid_p + hid_p * c_p)
    bytes_accessed = (
        x_p.size * 4
        + (w1.size + w2.size + w3.size) * 2            # bf16 weights
        + (b1.size + b2.size + b3.size) * 4             # f32 biases
        + b_pad * c_p * 4                               # f32 output
    )

    out = pl.pallas_call(
        classifier_kernel,
        out_shape=jax.ShapeDtypeStruct((b_pad, c_p), jnp.float32),
        grid=grid,
        in_specs=[
            # x: one batch tile per grid step (pipelined HBM->VMEM copies)
            pl.BlockSpec((tb, d_in_p), lambda i: (i, 0)),
            # weights/biases: constant index_map -> VMEM-resident across steps
            pl.BlockSpec((d_in_p, hid_p), lambda i: (0, 0)),
            pl.BlockSpec((1, hid_p), lambda i: (0, 0)),
            pl.BlockSpec((hid_p, hid_p), lambda i: (0, 0)),
            pl.BlockSpec((1, hid_p), lambda i: (0, 0)),
            pl.BlockSpec((hid_p, c_p), lambda i: (0, 0)),
            pl.BlockSpec((1, c_p), lambda i: (0, 0)),
        ],
        out_specs=pl.BlockSpec((tb, c_p), lambda i: (i, 0)),
        compiler_params=pltpu.CompilerParams(
            # batch tiles are independent -> shard across both TCs on v7x
            dimension_semantics=("parallel",),
        ),
        cost_estimate=pl.CostEstimate(
            flops=flops, transcendentals=0, bytes_accessed=bytes_accessed
        ),
    )(x_p, w1, b1, w2, b2, w3, b3)

    # Slice away batch padding and the lane padding of the logits.
    return out[:B, :n_classes]


# ------------------------- deterministic param init -------------------------
def init_linear(key, fan_in, fan_out):
    """PyTorch nn.Linear default init: U(-1/sqrt(fan_in), 1/sqrt(fan_in))."""
    kw, kb = jax.random.split(key)
    bound = 1.0 / jnp.sqrt(jnp.float32(fan_in))
    w = jax.random.uniform(kw, (fan_in, fan_out), jnp.float32, -bound, bound)
    b = jax.random.uniform(kb, (1, fan_out), jnp.float32, -bound, bound)
    return w, b


def reference_forward(x, params):
    w1, b1, w2, b2, w3, b3 = params
    h = jnp.maximum(x @ w1 + b1, 0.0)
    h = jnp.maximum(h @ w2 + b2, 0.0)
    return h @ w3 + b3


# ---------------------------------- main -------------------------------------
if __name__ == "__main__":
    key = jax.random.PRNGKey(0)
    k_x, k_l1, k_l2, k_l3 = jax.random.split(key, 4)

    batch = 256      # 2 batch tiles of 128 rows -> pipelined grid with >= 2 steps
    d_in = 32        # input feature dim (padded to 128 inside the wrapper)
    hidden = 32      # encoder hidden dim (padded to 128)
    n_classes = 8    # mlp head output dim (padded to 128, sliced back)

    x = jax.random.normal(k_x, (batch, d_in), jnp.float32)

    w1, b1 = init_linear(k_l1, d_in, hidden)        # encoder Linear 1
    w2, b2 = init_linear(k_l2, hidden, hidden)      # encoder Linear 2
    w3, b3 = init_linear(k_l3, hidden, n_classes)   # pred head
    params = (w1, b1, w2, b2, w3, b3)

    padded_params = prepare_params(params)          # pad + bf16-cast once

    out = classifier_forward(x, padded_params, n_classes=n_classes, tb=128)
    out = jax.block_until_ready(out)

    ref = reference_forward(x, params)
    assert out.shape == (batch, n_classes)
    # bf16 matmul inputs (f32 accumulation) vs. the f32 reference: loosened tolerance.
    assert jnp.allclose(out, ref, atol=5e-2, rtol=5e-2), "mismatch vs reference"

    print("KERNEL_OK")
</pallas_src>

<mosaic_0001>
module attributes {stable_mosaic.version = 11 : i64} {
  func.func @classifier_kernel(%arg0: i32, %arg1: memref<128x128xf32, #tpu.memory_space<vmem>>, %arg2: memref<128x128xbf16, #tpu.memory_space<vmem>>, %arg3: memref<1x128xf32, #tpu.memory_space<vmem>>, %arg4: memref<128x128xbf16, #tpu.memory_space<vmem>>, %arg5: memref<1x128xf32, #tpu.memory_space<vmem>>, %arg6: memref<128x128xbf16, #tpu.memory_space<vmem>>, %arg7: memref<1x128xf32, #tpu.memory_space<vmem>>, %arg8: memref<128x128xf32, #tpu.memory_space<vmem>>) attributes {dimension_semantics = [#tpu.dimension_semantics<parallel>], iteration_bounds = array<i64: 2>, scalar_prefetch = 0 : i64, scratch_operands = 0 : i64, tpu.core_type = #tpu.core_type<tc>, window_params = [{transform_indices = @transform_0, window_bounds = array<i64: 128, 128>}, {pipeline_mode = #tpu.pipeline_mode<synchronous>, transform_indices = @transform_1, window_bounds = array<i64: 128, 128>}, {pipeline_mode = #tpu.pipeline_mode<synchronous>, transform_indices = @transform_2, window_bounds = array<i64: 1, 128>}, {pipeline_mode = #tpu.pipeline_mode<synchronous>, transform_indices = @transform_3, window_bounds = array<i64: 128, 128>}, {pipeline_mode = #tpu.pipeline_mode<synchronous>, transform_indices = @transform_4, window_bounds = array<i64: 1, 128>}, {pipeline_mode = #tpu.pipeline_mode<synchronous>, transform_indices = @transform_5, window_bounds = array<i64: 128, 128>}, {pipeline_mode = #tpu.pipeline_mode<synchronous>, transform_indices = @transform_6, window_bounds = array<i64: 1, 128>}, {transform_indices = @transform_7, window_bounds = array<i64: 128, 128>}]} {
    %c0 = arith.constant 0 : index
    %c0_0 = arith.constant 0 : index
    %0 = vector.load %arg1[%c0, %c0_0] : memref<128x128xf32, #tpu.memory_space<vmem>>, vector<128x128xf32>
    %1 = arith.truncf %0 : vector<128x128xf32> to vector<128x128xbf16>
    %c0_1 = arith.constant 0 : index
    %c0_2 = arith.constant 0 : index
    %2 = vector.load %arg2[%c0_1, %c0_2] : memref<128x128xbf16, #tpu.memory_space<vmem>>, vector<128x128xbf16>
    %cst = arith.constant dense<0.000000e+00> : vector<128x128xf32>
    %3 = tpu.matmul %1, %2, %cst {dimension_numbers = #tpu.dot_dimension_numbers<[1], [0], [0], [1], [0, 0, 1, 1], [], []>} : vector<128x128xbf16>, vector<128x128xbf16>, vector<128x128xf32> -> vector<128x128xf32>
    %c0_3 = arith.constant 0 : index
    %c0_4 = arith.constant 0 : index
    %4 = vector.load %arg3[%c0_3, %c0_4] : memref<1x128xf32, #tpu.memory_space<vmem>>, vector<1x128xf32>
    %5 = vector.broadcast %4 : vector<1x128xf32> to vector<128x128xf32>
    %6 = arith.addf %3, %5 : vector<128x128xf32>
    %cst_5 = arith.constant 0.000000e+00 : f32
    %7 = vector.broadcast %cst_5 : f32 to vector<128x128xf32>
    %8 = arith.maximumf %6, %7 : vector<128x128xf32>
    %9 = arith.truncf %8 : vector<128x128xf32> to vector<128x128xbf16>
    %c0_6 = arith.constant 0 : index
    %c0_7 = arith.constant 0 : index
    %10 = vector.load %arg4[%c0_6, %c0_7] : memref<128x128xbf16, #tpu.memory_space<vmem>>, vector<128x128xbf16>
    %cst_8 = arith.constant dense<0.000000e+00> : vector<128x128xf32>
    %11 = tpu.matmul %9, %10, %cst_8 {dimension_numbers = #tpu.dot_dimension_numbers<[1], [0], [0], [1], [0, 0, 1, 1], [], []>} : vector<128x128xbf16>, vector<128x128xbf16>, vector<128x128xf32> -> vector<128x128xf32>
    %c0_9 = arith.constant 0 : index
    %c0_10 = arith.constant 0 : index
    %12 = vector.load %arg5[%c0_9, %c0_10] : memref<1x128xf32, #tpu.memory_space<vmem>>, vector<1x128xf32>
    %13 = vector.broadcast %12 : vector<1x128xf32> to vector<128x128xf32>
    %14 = arith.addf %11, %13 : vector<128x128xf32>
    %cst_11 = arith.constant 0.000000e+00 : f32
    %15 = vector.broadcast %cst_11 : f32 to vector<128x128xf32>
    %16 = arith.maximumf %14, %15 : vector<128x128xf32>
    %17 = arith.truncf %16 : vector<128x128xf32> to vector<128x128xbf16>
    %c0_12 = arith.constant 0 : index
    %c0_13 = arith.constant 0 : index
    %18 = vector.load %arg6[%c0_12, %c0_13] : memref<128x128xbf16, #tpu.memory_space<vmem>>, vector<128x128xbf16>
    %cst_14 = arith.constant dense<0.000000e+00> : vector<128x128xf32>
    %19 = tpu.matmul %17, %18, %cst_14 {dimension_numbers = #tpu.dot_dimension_numbers<[1], [0], [0], [1], [0, 0, 1, 1], [], []>} : vector<128x128xbf16>, vector<128x128xbf16>, vector<128x128xf32> -> vector<128x128xf32>
    %c0_15 = arith.constant 0 : index
    %c0_16 = arith.constant 0 : index
    %20 = vector.load %arg7[%c0_15, %c0_16] : memref<1x128xf32, #tpu.memory_space<vmem>>, vector<1x128xf32>
    %21 = vector.broadcast %20 : vector<1x128xf32> to vector<128x128xf32>
    %22 = arith.addf %19, %21 : vector<128x128xf32>
    %c0_17 = arith.constant 0 : index
    %c0_18 = arith.constant 0 : index
    %23 = vector.load %arg8[%c0_17, %c0_18] : memref<128x128xf32, #tpu.memory_space<vmem>>, vector<128x128xf32>
    tpu.vector_store %arg8[%c0_17, %c0_18], %22 {strides = array<i32>} : memref<128x128xf32, #tpu.memory_space<vmem>>, vector<128x128xf32>,
    return
  }
  func.func @transform_0(%arg0: i32) -> (i32, i32) {
    %c0_i32 = arith.constant 0 : i32
    %c0_i32_0 = arith.constant 0 : i32
    return %arg0, %c0_i32 : i32, i32
  }
  func.func @transform_1(%arg0: i32) -> (i32, i32) {
    %c0_i32 = arith.constant 0 : i32
    %c0_i32_0 = arith.constant 0 : i32
    %c0_i32_1 = arith.constant 0 : i32
    return %c0_i32, %c0_i32_0 : i32, i32
  }
  func.func @transform_2(%arg0: i32) -> (i32, i32) {
    %c0_i32 = arith.constant 0 : i32
    %c0_i32_0 = arith.constant 0 : i32
    %c0_i32_1 = arith.constant 0 : i32
    return %c0_i32, %c0_i32_0 : i32, i32
  }
  func.func @transform_3(%arg0: i32) -> (i32, i32) {
    %c0_i32 = arith.constant 0 : i32
    %c0_i32_0 = arith.constant 0 : i32
    %c0_i32_1 = arith.constant 0 : i32
    return %c0_i32, %c0_i32_0 : i32, i32
  }
  func.func @transform_4(%arg0: i32) -> (i32, i32) {
    %c0_i32 = arith.constant 0 : i32
    %c0_i32_0 = arith.constant 0 : i32
    %c0_i32_1 = arith.constant 0 : i32
    return %c0_i32, %c0_i32_0 : i32, i32
  }
  func.func @transform_5(%arg0: i32) -> (i32, i32) {
    %c0_i32 = arith.constant 0 : i32
    %c0_i32_0 = arith.constant 0 : i32
    %c0_i32_1 = arith.constant 0 : i32
    return %c0_i32, %c0_i32_0 : i32, i32
  }
  func.func @transform_6(%arg0: i32) -> (i32, i32) {
    %c0_i32 = arith.constant 0 : i32
    %c0_i32_0 = arith.constant 0 : i32
    %c0_i32_1 = arith.constant 0 : i32
    return %c0_i32, %c0_i32_0 : i32, i32
  }
  func.func @transform_7(%arg0: i32) -> (i32, i32) {
    %c0_i32 = arith.constant 0 : i32
    %c0_i32_0 = arith.constant 0 : i32
    return %arg0, %c0_i32 : i32, i32
  }
}

</mosaic_0001>

<bundles_post_ra>
// kernel: classifier_forward.1
= control target key start
LH: loop header
LB: loop body
LE: loop exit
PB: predicated region body
PF: predicated region fallthrough
CT: control target
= control target key end

     0   :  { %s1209_s24 = smov 0   ;;  %s1386_s0 = inlined_call_operand.vmem [shape: f32[256,128], index: 0, kind: input, shape index: {}]   ;;  %s1387_s1 = inlined_call_operand.vmem [shape: bf16[128,128], index: 1, kind: input, shape index: {}]   ;;  %s1388_s2 = inlined_call_operand.vmem [shape: f32[1,128], index: 2, kind: input, shape index: {}]   ;;  %s1389_s3 = inlined_call_operand.vmem [shape: bf16[128,128], index: 3, kind: input, shape index: {}]   ;;  %s1390_s4 = inlined_call_operand.vmem [shape: f32[1,128], index: 4, kind: input, shape index: {}]   ;;  %s1391_s5 = inlined_call_operand.vmem [shape: bf16[128,128], index: 5, kind: input, shape index: {}]   ;;  %s1392_s6 = inlined_call_operand.vmem [shape: f32[1,128], index: 6, kind: input, shape index: {}]   ;;  %s1393_s7 = inlined_call_operand.vmem [shape: f32[256,128], index: 7, kind: output, shape index: {}]  }
   0x1 LB: > { %s931_s25 = sadd.s32 4294967295, %s1167_s24   ;;  %p935_p0 = scmp.ge.s32.totalorder %s1167_s24, 1  ;;  %s1167_s24 = sphi %s1209_s24, %s17_s24  }
   0x2   : > { %p238_p1 = scmp.lt.s32.totalorder %s1167_s24, 3 }
   0x4   : > { %p239_p2 = pnand %p935_p0, %p238_p1 }
   0x5   : > { %v1137_v0 = vld [vmem:[%s1387_s1] sm:$0xff] (!%p239_p2)   ;;  %s936_s28 = sshll.u32 (!%p239_p2), %s931_s25, 4  ;;  %v1138_v1 = vld [vmem:[%s1387_s1 + $0x8] sm:$0xff] (!%p239_p2)   ;;  %v1139_v2 = vld [vmem:[%s1387_s1 + $0x10] sm:$0xff] (!%p239_p2)  }
   0x6   : > { %242 = sbr.rel (%p239_p2) target bundleno = 724 (0x2d4), region = 48  ;;  %p271_p3 = scmp.lt.s32.totalorder (!%p239_p2), %s936_s28, 31  ;;  %1017 = vmatprep.subr.bf16.mxu0 (!%p239_p2), %v1137_v0  ;;  %v1140_v3 = vld [vmem:[%s1387_s1 + $0x18] sm:$0xff] (!%p239_p2)   ;;  %v1141_v7 = vld [vmem:[%s1387_s1 + $0x20] sm:$0xff] (!%p239_p2)   ;;  %v1146_v9 = vld [vmem:[%s1389_s3 + $0x8] sm:$0xff] (!%p239_p2)  }
   0x7   : > { %1018 = vmatpush3.bf16.msra.mxu0 (!%p239_p2), %v1137_v0  ;;  %v1145_v8 = vld [vmem:[%s1389_s3] sm:$0xff] (!%p239_p2)   ;;  %v1142_v10 = vld [vmem:[%s1387_s1 + $0x28] sm:$0xff] (!%p239_p2)   ;;  %v1147_v11 = vld [vmem:[%s1389_s3 + $0x10] sm:$0xff] (!%p239_p2)  }
   0x8   : > { %1019 = vmatprep.subr.bf16.mxu0 (!%p239_p2), %v1138_v1  ;;  %1049 = vmatprep.subr.bf16.mxu1 (!%p239_p2), %v1145_v8  ;;  %v1143_v12 = vld [vmem:[%s1387_s1 + $0x30] sm:$0xff] (!%p239_p2)   ;;  %v1148_v13 = vld [vmem:[%s1389_s3 + $0x18] sm:$0xff] (!%p239_p2)   ;;  %v1149_v15 = vld [vmem:[%s1389_s3 + $0x20] sm:$0xff] (!%p239_p2)  }
   0x9   : > { %1050 = vmatpush3.bf16.msra.mxu1 (!%p239_p2), %v1145_v8  ;;  %v1144_v14 = vld [vmem:[%s1387_s1 + $0x38] sm:$0xff] (!%p239_p2)   ;;  %v1150_v21 = vld [vmem:[%s1389_s3 + $0x28] sm:$0xff] (!%p239_p2)   ;;  %v1151_v38 = vld [vmem:[%s1389_s3 + $0x30] sm:$0xff] (!%p239_p2)  }
   0xa   : > { %1051 = vmatprep.subr.bf16.mxu1 (!%p239_p2), %v1146_v9  ;;  %v1152_v39 = vld [vmem:[%s1389_s3 + $0x38] sm:$0xff] (!%p239_p2)   ;;  %v1153_v40 = vld [vmem:[%s1391_s5] sm:$0xff] (!%p239_p2)   ;;  %v1154_v41 = vld [vmem:[%s1391_s5 + $0x8] sm:$0xff] (!%p239_p2)  }
   0xb   : > { %1020 = vmatpush3.bf16.msra.mxu0 (!%p239_p2), %v1138_v1  ;;  %v1155_v42 = vld [vmem:[%s1391_s5 + $0x10] sm:$0xff] (!%p239_p2)   ;;  %v1303_v43 = vld [vmem:[%s1391_s5 + $0x18] sm:$0xff] (!%p239_p2)   ;;  %v1309_v44 = vld [vmem:[%s1391_s5 + $0x20] sm:$0xff] (!%p239_p2)  }
   0xc   : > { %1021 = vmatprep.subr.bf16.mxu0 (!%p239_p2), %v1139_v2  ;;  %v1316_v45 = vld [vmem:[%s1391_s5 + $0x28] sm:$0xff] (!%p239_p2)   ;;  %v1324_v46 = vld [vmem:[%s1388_s2] ss:$0 sm:$0xff] (!%p239_p2) }
   0xd   : > { %s1395_s28 = smov (!%p271_p3, %s936_s28), 31  ;;  %1052 = vmatpush3.bf16.msra.mxu1 %v1146_v9 }
   0xe   : > { %s937_s10 = sshll.u32 %s1395_s28, 3  ;;  %1053 = vmatprep.subr.bf16.mxu1 %v1147_v11 }
   0xf   : > { %s1234_s13 = scalar_lea.vmem %s1386_s0, %s937_s10  ;;  %1022 = vmatpush3.bf16.msra.mxu0 %v1139_v2  ;;  %s1365_s25 = scalar_lea.vmem %s1393_s7, %s937_s10 }
  0x10   : > { %v283_v4 = vld [vmem:[%s1234_s13] sm:$0xff]  ;;  %v284_v5 = vld [vmem:[%s1234_s13 + $0x8] sm:$0xff]  ;;  %1023 = vmatprep.subr.bf16.mxu0 %v1140_v3  ;;  %v285_v16 = vld [vmem:[%s1234_s13 + $0x10] sm:$0xff] }
  0x11   : > { %v299_v6 = vpack.c.bf16 %v284_v5, %v283_v4  ;;  %1054 = vmatpush3.bf16.msra.mxu1 %v1147_v11  ;;  %v286_v17 = vld [vmem:[%s1234_s13 + $0x18] sm:$0xff]  ;;  %v287_v18 = vld [vmem:[%s1234_s13 + $0x20] sm:$0xff]  ;;  %v288_v19 = vld [vmem:[%s1234_s13 + $0x28] sm:$0xff] }
  0x12   : > { %1055 = vmatprep.subr.bf16.mxu1 %v1148_v13  ;;  %v300_v20 = vpack.c.bf16 %v286_v17, %v285_v16  ;;  %v301_v22 = vpack.c.bf16 %v288_v19, %v287_v18  ;;  %v289_v23 = vld [vmem:[%s1234_s13 + $0x30] sm:$0xff]  ;;  %v290_v24 = vld [vmem:[%s1234_s13 + $0x38] sm:$0xff]  ;;  %v291_v25 = vld [vmem:[%s1234_s13 + $0x40] sm:$0xff] }
  0x13   : > { %1033 = vmatprep.mubr.bf16.mxu0 %v299_v6  ;;  %1024 = vmatpush3.bf16.msra.mxu0 %v1140_v3  ;;  %v292_v26 = vld [vmem:[%s1234_s13 + $0x48] sm:$0xff]  ;;  %v302_v27 = vpack.c.bf16 %v290_v24, %v289_v23  ;;  %v293_v29 = vld [vmem:[%s1234_s13 + $0x50] sm:$0xff]  ;;  %v294_v30 = vld [vmem:[%s1234_s13 + $0x58] sm:$0xff] }
  0x14   : > { %1025 = vmatprep.subr.bf16.mxu0 %v1141_v7  ;;  %v303_v28 = vpack.c.bf16 %v292_v26, %v291_v25  ;;  %v295_v31 = vld [vmem:[%s1234_s13 + $0x60] sm:$0xff]  ;;  %v296_v32 = vld [vmem:[%s1234_s13 + $0x68] sm:$0xff]  ;;  %v304_v33 = vpack.c.bf16 %v294_v30, %v293_v29  ;;  %v297_v35 = vld [vmem:[%s1234_s13 + $0x70] sm:$0xff] }
  0x15   : > { %1056 = vmatpush3.bf16.msra.mxu1 %v1148_v13  ;;  %v305_v34 = vpack.c.bf16 %v296_v32, %v295_v31  ;;  %v298_v36 = vld [vmem:[%s1234_s13 + $0x78] sm:$0xff] }
  0x16   : > { %1057 = vmatprep.subr.bf16.mxu1 %v1149_v15  ;;  %v306_v37 = vpack.c.bf16 %v298_v36, %v297_v35 }
  0x17   : > { %1026 = vmatpush3.bf16.msra.mxu0 %v1141_v7 }
  0x18   : > { %1027 = vmatprep.subr.bf16.mxu0 %v1142_v10 }
  0x19   : > { %1058 = vmatpush3.bf16.msra.mxu1 %v1149_v15 }
  0x1a   : > { %1059 = vmatprep.subr.bf16.mxu1 %v1150_v21 }
  0x1b   : > { %1028 = vmatpush3.bf16.msra.mxu0 %v1142_v10 }
  0x1c   : > { %1029 = vmatprep.subr.bf16.mxu0 %v1143_v12 }
  0x1d   : > { %1060 = vmatpush3.bf16.msra.mxu1 %v1150_v21 }
  0x1e   : > { %1061 = vmatprep.subr.bf16.mxu1 %v1151_v38 }
  0x1f   : > { %1030 = vmatpush3.bf16.msra.mxu0 %v1143_v12 }
  0x20   : > { %1031 = vmatprep.subr.bf16.mxu0 %v1144_v14 }
  0x21   : > { %1062 = vmatpush3.bf16.msra.mxu1 %v1151_v38 }
  0x22   : > { %1063 = vmatprep.subr.bf16.mxu1 %v1152_v39 }
  0x23   : > { %1032 = vmatpush3.bf16.msra.mxu0 %v1144_v14 }
  0x24   : > { %1081 = vmatprep.subr.bf16.mxu0 %v1153_v40 }
  0x25   : > { %1064 = vmatpush3.bf16.msra.mxu1 %v1152_v39  ;;  %v1159_v39 = vld [vmem:[%s1391_s5 + $0x30] sm:$0xff]  }
  0x26   : > { %1034 = vmatmul.mubr.bf16.vlgmr.msra.gmra.mrb[0].mxu0 %v300_v20  ;;  %1113 = vmatprep.subr.bf16.mxu1 %v1153_v40 }
  0x27   : > { %1037 = vmatprep.mubr.bf16.mxu0 %v301_v22  ;;  %1082 = vmatpush3.bf16.msra.mxu0 %v1153_v40 }
  0x28   : > { %1083 = vmatprep.subr.bf16.mxu0 %v1154_v41 }
  0x2b   : > { %1084 = vmatpush3.bf16.msra.mxu0 %v1154_v41 }
  0x2c   : > { %1085 = vmatprep.subr.bf16.mxu0 %v1155_v42 }
  0x2e   : > { %1038 = vmatmul.mubr.bf16.gmra.mrb[4].mxu0 %v302_v27 }
  0x2f   : > { %1041 = vmatprep.mubr.bf16.mxu0 %v303_v28  ;;  %1086 = vmatpush3.bf16.msra.mxu0 %v1155_v42 }
  0x30   : > { %1087 = vmatprep.subr.bf16.mxu0 %v1303_v43 }
  0x33   : > { %1088 = vmatpush3.bf16.msra.mxu0 %v1303_v43 }
  0x34   : > { %1089 = vmatprep.subr.bf16.mxu0 %v1309_v44 }
  0x36   : > { %1042 = vmatmul.mubr.bf16.gmra.mrb[8].mxu0 %v304_v33 }
  0x37   : > { %1045 = vmatprep.mubr.bf16.mxu0 %v305_v34  ;;  %1090 = vmatpush3.bf16.msra.mxu0 %v1309_v44 }
  0x38   : > { %1091 = vmatprep.subr.bf16.mxu0 %v1316_v45 }
  0x3b   : > { %1092 = vmatpush3.bf16.msra.mxu0 %v1316_v45 }
  0x3c   : > { %1093 = vmatprep.subr.bf16.mxu0 %v1159_v39 }
  0x3e   : > { %1046 = vmatmul.mubr.bf16.gmra.mrb[12].mxu0 %v306_v37 }
  0x3f   : > { %1094 = vmatpush3.bf16.msra.mxu0 %v1159_v39 }
  0xf9   : > { %v1035_v47 = vpop.f32.mrb[0].mxu0 }
  0xfa   : > { %v421_v48 = vadd.f32 %v1035_v47, %v1324_v46  ;;  %v412_v49 = vpop.f32.mrb[1].mxu0 }
  0xfb   : > { %v413_v50 = vadd.f32 %v1324_v46, %v412_v49  ;;  %v1036_v51 = vpop.f32.mrb[2].mxu0 }
  0xfc   : > { %v424_v52 = vadd.f32 %v1036_v51, %v1324_v46  ;;  %v415_v53 = vpop.f32.mrb[3].mxu0  ;;  %v477_v55 = vmax.f32 %v421_v48, 0.0 }
  0xfd   : > { %v416_v54 = vadd.f32 %v1324_v46, %v415_v53  ;;  %v475_v57 = vmax.f32 %v413_v50, 0.0 }
  0xfe   : > { %v478_v56 = vmax.f32 %v424_v52, 0.0 }
  0xff   : > { %v476_v58 = vmax.f32 %v416_v54, 0.0 }
 0x100   : > { %v492_v59 = vpack.c.bf16 %v478_v56, %v477_v55 }
 0x101   : > { %v1039_v60 = vpop.f32.mrb[4].mxu0  ;;  %v491_v61 = vpack.c.bf16 %v476_v58, %v475_v57 }
 0x102   : > { %v437_v62 = vadd.f32 %v1039_v60, %v1324_v46  ;;  %v428_v63 = vpop.f32.mrb[5].mxu0 }
 0x103   : > { %v429_v0 = vadd.f32 %v1324_v46, %v428_v63  ;;  %v1040_v1 = vpop.f32.mrb[6].mxu0  ;;  %1065 = vmatprep.mubr.bf16.mxu1 %v491_v61 }
 0x104   : > { %v440_v2 = vadd.f32 %v1040_v1, %v1324_v46  ;;  %v431_v3 = vpop.f32.mrb[7].mxu0  ;;  %1066 = vmatmul.mubr.bf16.vlgmr.msra.gmra.mrb[0].mxu1 %v492_v59  ;;  %v481_v5 = vmax.f32 %v437_v62, 0.0 }
 0x105   : > { %v432_v4 = vadd.f32 %v1324_v46, %v431_v3  ;;  %1121 = vmatpush3.bf16.msra.mxu1 %v1153_v40  ;;  %v479_v7 = vmax.f32 %v429_v0, 0.0  ;;  %v1160_v40 = vld [vmem:[%s1391_s5 + $0x38] sm:$0xff]  }
 0x106   : > { %v482_v6 = vmax.f32 %v440_v2, 0.0  ;;  %1114 = vmatprep.subr.bf16.mxu1 %v1154_v41  ;;  %1095 = vmatprep.subr.bf16.mxu0 %v1160_v40 }
 0x107   : > { %v480_v8 = vmax.f32 %v432_v4, 0.0  ;;  %1096 = vmatpush3.bf16.msra.mxu0 %v1160_v40 }
 0x108   : > { %v494_v9 = vpack.c.bf16 %v482_v6, %v481_v5 }
 0x109   : > { %v493_v10 = vpack.c.bf16 %v480_v8, %v479_v7  ;;  %v1043_v11 = vpop.f32.mrb[8].mxu0  ;;  %1122 = vmatpush3.bf16.msra.mxu1 %v1154_v41  ;;  %v949_v41 = vld [vmem:[%s1390_s4] ss:$0 sm:$0xff] }
 0x10a   : > { %v453_v12 = vadd.f32 %v1043_v11, %v1324_v46  ;;  %v444_v13 = vpop.f32.mrb[9].mxu0  ;;  %1115 = vmatprep.subr.bf16.mxu1 %v1155_v42 }
 0x10b   : > { %v445_v14 = vadd.f32 %v1324_v46, %v444_v13  ;;  %v1044_v15 = vpop.f32.mrb[10].mxu0  ;;  %1069 = vmatprep.mubr.bf16.mxu1 %v493_v10 }
 0x10c   : > { %v456_v16 = vadd.f32 %v1044_v15, %v1324_v46  ;;  %v447_v17 = vpop.f32.mrb[11].mxu0  ;;  %1070 = vmatmul.mubr.bf16.gmra.mrb[4].mxu1 %v494_v9  ;;  %v485_v19 = vmax.f32 %v453_v12, 0.0 }
 0x10d   : > { %v448_v18 = vadd.f32 %v1324_v46, %v447_v17  ;;  %1123 = vmatpush3.bf16.msra.mxu1 %v1155_v42  ;;  %v483_v21 = vmax.f32 %v445_v14, 0.0 }
 0x10e   : > { %v486_v20 = vmax.f32 %v456_v16, 0.0  ;;  %1116 = vmatprep.subr.bf16.mxu1 %v1303_v43 }
 0x10f   : > { %v484_v22 = vmax.f32 %v448_v18, 0.0 }
 0x110   : > { %v496_v23 = vpack.c.bf16 %v486_v20, %v485_v19 }
 0x111   : > { %v495_v24 = vpack.c.bf16 %v484_v22, %v483_v21  ;;  %v1047_v25 = vpop.f32.mrb[12].mxu0  ;;  %1124 = vmatpush3.bf16.msra.mxu1 %v1303_v43 }
 0x112   : > { %v469_v26 = vadd.f32 %v1047_v25, %v1324_v46  ;;  %v460_v27 = vpop.f32.mrb[13].mxu0  ;;  %1117 = vmatprep.subr.bf16.mxu1 %v1309_v44 }
 0x113   : > { %v461_v28 = vadd.f32 %v1324_v46, %v460_v27  ;;  %v1048_v29 = vpop.f32.mrb[14].mxu0  ;;  %1073 = vmatprep.mubr.bf16.mxu1 %v495_v24 }
 0x114   : > { %v472_v30 = vadd.f32 %v1048_v29, %v1324_v46  ;;  %v463_v31 = vpop.f32.mrb[15].mxu0  ;;  %1074 = vmatmul.mubr.bf16.gmra.mrb[8].mxu1 %v496_v23  ;;  %v489_v33 = vmax.f32 %v469_v26, 0.0 }
 0x115   : > { %v464_v32 = vadd.f32 %v1324_v46, %v463_v31  ;;  %1125 = vmatpush3.bf16.msra.mxu1 %v1309_v44  ;;  %v487_v35 = vmax.f32 %v461_v28, 0.0 }
 0x116   : > { %v490_v34 = vmax.f32 %v472_v30, 0.0  ;;  %1118 = vmatprep.subr.bf16.mxu1 %v1316_v45 }
 0x117   : > { %v488_v36 = vmax.f32 %v464_v32, 0.0 }
 0x118   : > { %v498_v37 = vpack.c.bf16 %v490_v34, %v489_v33  ;;  %v958_v34 = vld [vmem:[%s1392_s6] ss:$0 sm:$0xff] }
 0x119   : > { %v497_v38 = vpack.c.bf16 %v488_v36, %v487_v35  ;;  %1126 = vmatpush3.bf16.msra.mxu1 %v1316_v45 }
 0x11a   : > { %1119 = vmatprep.subr.bf16.mxu1 %v1159_v39 }
 0x11b   : > { %1077 = vmatprep.mubr.bf16.mxu1 %v497_v38 }
 0x11c   : > { %1078 = vmatmul.mubr.bf16.gmra.mrb[12].mxu1 %v498_v37 }
 0x11d   : > { %1127 = vmatpush3.bf16.msra.mxu1 %v1159_v39 }
 0x11e   : > { %1120 = vmatprep.subr.bf16.mxu1 %v1160_v40 }
 0x121   : > { %1128 = vmatpush3.bf16.msra.mxu1 %v1160_v40 }
 0x1d7   : > { %v1067_v42 = vpop.f32.mrb[0].mxu1 }
 0x1d8   : > { %v613_v43 = vadd.f32 %v1067_v42, %v949_v41  ;;  %v604_v44 = vpop.f32.mrb[1].mxu1 }
 0x1d9   : > { %v605_v45 = vadd.f32 %v949_v41, %v604_v44  ;;  %v1068_v46 = vpop.f32.mrb[2].mxu1 }
 0x1da   : > { %v616_v47 = vadd.f32 %v1068_v46, %v949_v41  ;;  %v607_v48 = vpop.f32.mrb[3].mxu1  ;;  %v669_v50 = vmax.f32 %v613_v43, 0.0 }
 0x1db   : > { %v608_v49 = vadd.f32 %v949_v41, %v607_v48  ;;  %v667_v52 = vmax.f32 %v605_v45, 0.0 }
 0x1dc   : > { %v670_v51 = vmax.f32 %v616_v47, 0.0 }
 0x1dd   : > { %v668_v53 = vmax.f32 %v608_v49, 0.0 }
 0x1de   : > { %v684_v54 = vpack.c.bf16 %v670_v51, %v669_v50 }
 0x1df   : > { %v683_v55 = vpack.c.bf16 %v668_v53, %v667_v52  ;;  %v1071_v56 = vpop.f32.mrb[4].mxu1 }
 0x1e0   : > { %v629_v57 = vadd.f32 %v1071_v56, %v949_v41  ;;  %v620_v58 = vpop.f32.mrb[5].mxu1 }
 0x1e1   : > { %v621_v59 = vadd.f32 %v949_v41, %v620_v58  ;;  %v1072_v60 = vpop.f32.mrb[6].mxu1  ;;  %1097 = vmatprep.mubr.bf16.mxu0 %v683_v55 }
 0x1e2   : > { %v632_v61 = vadd.f32 %v1072_v60, %v949_v41  ;;  %v623_v62 = vpop.f32.mrb[7].mxu1  ;;  %1098 = vmatmul.mubr.bf16.vlgmr.msra.gmra.mrb[16].mxu0 %v684_v54  ;;  %v673_v0 = vmax.f32 %v629_v57, 0.0 }
 0x1e3   : > { %v624_v63 = vadd.f32 %v949_v41, %v623_v62  ;;  %v671_v2 = vmax.f32 %v621_v59, 0.0 }
 0x1e4   : > { %v674_v1 = vmax.f32 %v632_v61, 0.0 }
 0x1e5   : > { %v672_v3 = vmax.f32 %v624_v63, 0.0 }
 0x1e6   : > { %v686_v4 = vpack.c.bf16 %v674_v1, %v673_v0 }
 0x1e7   : > { %v685_v5 = vpack.c.bf16 %v672_v3, %v671_v2  ;;  %v1075_v6 = vpop.f32.mrb[8].mxu1 }
 0x1e8   : > { %v645_v7 = vadd.f32 %v1075_v6, %v949_v41  ;;  %v636_v8 = vpop.f32.mrb[9].mxu1 }
 0x1e9   : > { %v637_v9 = vadd.f32 %v949_v41, %v636_v8  ;;  %v1076_v10 = vpop.f32.mrb[10].mxu1  ;;  %1101 = vmatprep.mubr.bf16.mxu0 %v685_v5 }
 0x1ea   : > { %v648_v11 = vadd.f32 %v1076_v10, %v949_v41  ;;  %v639_v12 = vpop.f32.mrb[11].mxu1  ;;  %1102 = vmatmul.mubr.bf16.gmra.mrb[20].mxu0 %v686_v4  ;;  %v677_v14 = vmax.f32 %v645_v7, 0.0 }
 0x1eb   : > { %v640_v13 = vadd.f32 %v949_v41, %v639_v12  ;;  %v675_v16 = vmax.f32 %v637_v9, 0.0 }
 0x1ec   : > { %v678_v15 = vmax.f32 %v648_v11, 0.0 }
 0x1ed   : > { %v676_v17 = vmax.f32 %v640_v13, 0.0 }
 0x1ee   : > { %v688_v18 = vpack.c.bf16 %v678_v15, %v677_v14 }
 0x1ef   : > { %v687_v19 = vpack.c.bf16 %v676_v17, %v675_v16  ;;  %v1079_v20 = vpop.f32.mrb[12].mxu1 }
 0x1f0   : > { %v661_v21 = vadd.f32 %v1079_v20, %v949_v41  ;;  %v652_v22 = vpop.f32.mrb[13].mxu1 }
 0x1f1   : > { %v653_v23 = vadd.f32 %v949_v41, %v652_v22  ;;  %v1080_v24 = vpop.f32.mrb[14].mxu1  ;;  %1105 = vmatprep.mubr.bf16.mxu1 %v687_v19 }
 0x1f2   : > { %v664_v25 = vadd.f32 %v1080_v24, %v949_v41  ;;  %v655_v26 = vpop.f32.mrb[15].mxu1  ;;  %1106 = vmatmul.mubr.bf16.vlgmr.msra.gmra.mrb[16].mxu1 %v688_v18  ;;  %v681_v28 = vmax.f32 %v661_v21, 0.0 }
 0x1f3   : > { %v656_v27 = vadd.f32 %v949_v41, %v655_v26  ;;  %v679_v30 = vmax.f32 %v653_v23, 0.0 }
 0x1f4   : > { %v682_v29 = vmax.f32 %v664_v25, 0.0 }
 0x1f5   : > { %v680_v31 = vmax.f32 %v656_v27, 0.0 }
 0x1f6   : > { %v690_v32 = vpack.c.bf16 %v682_v29, %v681_v28 }
 0x1f7   : > { %v689_v33 = vpack.c.bf16 %v680_v31, %v679_v30 }
 0x1f9   : > { %1109 = vmatprep.mubr.bf16.mxu1 %v689_v33 }
 0x1fa   : > { %1110 = vmatmul.mubr.bf16.gmra.mrb[20].mxu1 %v690_v32 }
 0x2b5   : > { %v1099_v35 = vpop.f32.mrb[16].mxu0 }
 0x2b6   : > { %v805_v36 = vadd.f32 %v1099_v35, %v958_v34  ;;  %v796_v37 = vpop.f32.mrb[17].mxu0 }
 0x2b7   : > { %v797_v38 = vadd.f32 %v958_v34, %v796_v37  ;;  %v1100_v39 = vpop.f32.mrb[18].mxu0 }
 0x2b8   : > { %861 = vst [vmem:[%s1365_s25 + $0x10] sm:$0xff] %v805_v36  ;;  %v808_v40 = vadd.f32 %v1100_v39, %v958_v34  ;;  %v799_v41 = vpop.f32.mrb[19].mxu0 }
 0x2b9   : > { %859 = vst [vmem:[%s1365_s25] sm:$0xff] %v797_v38  ;;  %v800_v42 = vadd.f32 %v958_v34, %v799_v41 }
 0x2ba   : > { %862 = vst [vmem:[%s1365_s25 + $0x18] sm:$0xff] %v808_v40 }
 0x2bb   : > { %860 = vst [vmem:[%s1365_s25 + $0x8] sm:$0xff] %v800_v42 }
 0x2bd   : > { %v1103_v43 = vpop.f32.mrb[20].mxu0 }
 0x2be   : > { %v821_v44 = vadd.f32 %v1103_v43, %v958_v34  ;;  %v812_v45 = vpop.f32.mrb[21].mxu0 }
 0x2bf   : > { %v813_v46 = vadd.f32 %v958_v34, %v812_v45  ;;  %v1104_v47 = vpop.f32.mrb[22].mxu0 }
 0x2c0   : > { %865 = vst [vmem:[%s1365_s25 + $0x30] sm:$0xff] %v821_v44  ;;  %v824_v48 = vadd.f32 %v1104_v47, %v958_v34  ;;  %v815_v49 = vpop.f32.mrb[23].mxu0 }
 0x2c1   : > { %863 = vst [vmem:[%s1365_s25 + $0x20] sm:$0xff] %v813_v46  ;;  %v816_v50 = vadd.f32 %v958_v34, %v815_v49 }
 0x2c2   : > { %866 = vst [vmem:[%s1365_s25 + $0x38] sm:$0xff] %v824_v48 }
 0x2c3   : > { %864 = vst [vmem:[%s1365_s25 + $0x28] sm:$0xff] %v816_v50 }
 0x2c5   : > { %v1107_v51 = vpop.f32.mrb[16].mxu1 }
 0x2c6   : > { %v837_v52 = vadd.f32 %v1107_v51, %v958_v34  ;;  %v828_v53 = vpop.f32.mrb[17].mxu1 }
 0x2c7   : > { %v829_v54 = vadd.f32 %v958_v34, %v828_v53  ;;  %v1108_v55 = vpop.f32.mrb[18].mxu1 }
 0x2c8   : > { %869 = vst [vmem:[%s1365_s25 + $0x50] sm:$0xff] %v837_v52  ;;  %v840_v56 = vadd.f32 %v1108_v55, %v958_v34  ;;  %v831_v57 = vpop.f32.mrb[19].mxu1 }
 0x2c9   : > { %867 = vst [vmem:[%s1365_s25 + $0x40] sm:$0xff] %v829_v54  ;;  %v832_v58 = vadd.f32 %v958_v34, %v831_v57 }
 0x2ca   : > { %870 = vst [vmem:[%s1365_s25 + $0x58] sm:$0xff] %v840_v56 }
 0x2cb   : > { %868 = vst [vmem:[%s1365_s25 + $0x48] sm:$0xff] %v832_v58 }
 0x2cd   : > { %v1111_v59 = vpop.f32.mrb[20].mxu1 }
 0x2ce   : > { %v853_v60 = vadd.f32 %v1111_v59, %v958_v34  ;;  %v844_v61 = vpop.f32.mrb[21].mxu1 }
 0x2cf   : > { %v845_v62 = vadd.f32 %v958_v34, %v844_v61  ;;  %v1112_v63 = vpop.f32.mrb[22].mxu1 }
 0x2d0   : > { %873 = vst [vmem:[%s1365_s25 + $0x70] sm:$0xff] %v853_v60  ;;  %v856_v0 = vadd.f32 %v1112_v63, %v958_v34  ;;  %v847_v1 = vpop.f32.mrb[23].mxu1 }
 0x2d1   : > { %871 = vst [vmem:[%s1365_s25 + $0x60] sm:$0xff] %v845_v62  ;;  %v848_v2 = vadd.f32 %v958_v34, %v847_v1 }
 0x2d2   : > { %874 = vst [vmem:[%s1365_s25 + $0x78] sm:$0xff] %v856_v0 }
 0x2d3   : > { %872 = vst [vmem:[%s1365_s25 + $0x68] sm:$0xff] %v848_v2 }
 0x2d4 PF: > { %s17_s24 = sadd.s32 1, %s1167_s24  }
 0x2d5   : > { %p14_p4 = scmp.ge.s32.totalorder %s17_s24, 4  }
 0x2d7   :  { %16 = sbr.rel (!%p14_p4) target bundleno = 1 (0x1), region = 78 }

</bundles_post_ra>
